<compile_context>
chip_gen: v7x
topology: tpu7x:2x2x1
jax: 0.10.0
libtpu: 0.0.40
codegen_flags: <defaults>
</compile_context>

<pallas_src>
import jax
import jax.numpy as jnp
from jax.experimental import pallas as pl
from jax.experimental.pallas import tpu as pltpu


_TILE_BUDGET_BYTES = 24 << 20   # 2x double-buffered (z + out) tiles
_VMEM_LIMIT_BYTES = 48 << 20    # leaves headroom under v7x's 64 MiB per-TC VMEM


def flow_kernel(z_ref, w_ref, b_ref, s_ref, o_ref):
    # z: (TB, D_pad)   w, s: (1, D_pad)   b: (1,) scalar in SMEM
    z = z_ref[...]
    # F.linear(z, weight, bias): row-wise dot with the single weight row plus
    # the scalar bias -> (TB, 1). VPU multiply + XLU lane reduce, f32 accum.
    act = jnp.sum(z.astype(jnp.float32) * w_ref[...].astype(jnp.float32),
                  axis=-1, keepdims=True) + b_ref[0]
    # tanh on the EUP in f32, then the broadcasted output path in the native
    # dtype (matches PyTorch low-precision elementwise math and avoids a
    # full-width f32 intermediate tile for bf16/int8 inputs).
    t = jnp.tanh(act).astype(z.dtype)          # (TB, 1)
    o_ref[...] = z + s_ref[...] * t            # (TB, D_pad), native dtype


def _sublane_multiple(dtype) -> int:
    itemsize = jnp.dtype(dtype).itemsize
    return {4: 8, 2: 16, 1: 32}.get(itemsize, 8)


def flow_forward(z, weight, bias, scale, *, tb=None):
    """z: (B, D); weight: (1, D); bias: (1,); scale: (1, D) -> (B, D)."""
    B, D = z.shape
    dtype = z.dtype
    itemsize = jnp.dtype(dtype).itemsize
    sub = _sublane_multiple(dtype)

    # Lane-dense feature axis (multiple of 128 lanes).
    D_pad = pl.cdiv(D, 128) * 128
    need_d_pad = D_pad != D

    # The feature axis is never tiled; guard against an over-budget tile.
    if 4 * sub * D_pad * itemsize > _TILE_BUDGET_BYTES:
        # TODO(synk): add a feature-axis grid dim with a (tb, 1) f32 act
        # accumulator for very large D instead of erroring out.
        raise ValueError(f"feature dim {D} too large for un-tiled kernel")

    # Batch tile: sublane-aligned, balanced across grid steps (padding is at
    # most ~sub rows per tile), sized to the VMEM tile budget, and split into
    # at least 2 grid steps when B permits (keeps both v7x TCs streaming).
    if tb is None:
        max_rows = max(sub, _TILE_BUDGET_BYTES // (4 * D_pad * itemsize))
        n_tiles = pl.cdiv(B, max_rows)
        if B > sub:
            n_tiles = max(n_tiles, 2)
        tb = pl.cdiv(pl.cdiv(B, n_tiles), sub) * sub
    else:
        tb = max(sub, (tb // sub) * sub)
        if 4 * tb * D_pad * itemsize > _VMEM_LIMIT_BYTES:
            raise ValueError(f"tb={tb} with D={D} exceeds the VMEM budget")
    B_pad = pl.cdiv(B, tb) * tb
    need_b_pad = B_pad != B

    # Only pad when actually needed: in the aligned case z goes straight to
    # the kernel (no extra HBM read+write copy, no output slice).
    if need_d_pad or need_b_pad:
        z_in = jnp.zeros((B_pad, D_pad), dtype).at[:B, :D].set(z)
    else:
        z_in = z
    if need_d_pad:
        w_in = jnp.zeros((1, D_pad), weight.dtype).at[:, :D].set(weight)
        s_in = jnp.zeros((1, D_pad), scale.dtype).at[:, :D].set(scale)
    else:
        w_in = weight
        s_in = scale
    b_in = bias.reshape(1).astype(jnp.float32)   # 1-D scalar for SMEM

    grid = (B_pad // tb,)
    out = pl.pallas_call(
        flow_kernel,
        out_shape=jax.ShapeDtypeStruct((B_pad, D_pad), dtype),
        grid=grid,
        in_specs=[
            # z tile marches over the batch axis (pipelined / double-buffered).
            pl.BlockSpec((tb, D_pad), lambda i: (i, 0)),
            # weight / scale: constant block index -> stay VMEM-resident.
            pl.BlockSpec((1, D_pad), lambda i: (0, 0)),
            # scalar bias lives in SMEM (1-D, a few bytes, no broadcast DMA).
            pl.BlockSpec(memory_space=pltpu.MemorySpace.SMEM),
            pl.BlockSpec((1, D_pad), lambda i: (0, 0)),
        ],
        out_specs=pl.BlockSpec((tb, D_pad), lambda i: (i, 0)),
        compiler_params=pltpu.CompilerParams(
            dimension_semantics=("parallel",),
            vmem_limit_bytes=_VMEM_LIMIT_BYTES),
    )(z_in, w_in, b_in, s_in)

    if need_d_pad or need_b_pad:
        out = out[:B, :D]
    return out


if __name__ == "__main__":
    key = jax.random.PRNGKey(0)

    def reference(z, weight, bias, scale):
        act = z @ weight.T + bias             # (B, 1)
        return z + scale * jnp.tanh(act)      # (B, D)

    # Case 1: small, non-multiples of (8, 128) -> exercises the padded path
    # and a multi-step grid (explicit tb=8).
    B, D = 24, 50
    k_z, k_w, k_s, k_b = jax.random.split(key, 4)
    z = jax.random.normal(k_z, (B, D), dtype=jnp.float32)
    # reset_parameters(): uniform(-0.1, 0.1) for weight, scale, bias
    weight = jax.random.uniform(k_w, (1, D), minval=-0.1, maxval=0.1,
                                dtype=jnp.float32)
    scale = jax.random.uniform(k_s, (1, D), minval=-0.1, maxval=0.1,
                               dtype=jnp.float32)
    bias = jax.random.uniform(k_b, (1,), minval=-0.1, maxval=0.1,
                              dtype=jnp.float32)
    out = jax.block_until_ready(flow_forward(z, weight, bias, scale, tb=8))
    assert out.shape == (B, D)
    assert jnp.allclose(out, reference(z, weight, bias, scale),
                        atol=1e-5, rtol=1e-5)

    # Case 2: aligned shapes -> exercises the zero-copy (no pad / no slice)
    # path with the auto-balanced tile size.
    B2, D2 = 32, 128
    k_z2, k_w2, k_s2, k_b2 = jax.random.split(jax.random.PRNGKey(1), 4)
    z2 = jax.random.normal(k_z2, (B2, D2), dtype=jnp.float32)
    w2 = jax.random.uniform(k_w2, (1, D2), minval=-0.1, maxval=0.1,
                            dtype=jnp.float32)
    s2 = jax.random.uniform(k_s2, (1, D2), minval=-0.1, maxval=0.1,
                            dtype=jnp.float32)
    b2 = jax.random.uniform(k_b2, (1,), minval=-0.1, maxval=0.1,
                            dtype=jnp.float32)
    out2 = jax.block_until_ready(flow_forward(z2, w2, b2, s2))
    assert out2.shape == (B2, D2)
    assert jnp.allclose(out2, reference(z2, w2, b2, s2), atol=1e-5, rtol=1e-5)

    print("KERNEL_OK")
</pallas_src>

<mosaic_0001>
module attributes {stable_mosaic.version = 11 : i64} {
  func.func @flow_kernel(%arg0: i32, %arg1: memref<8x128xf32, #tpu.memory_space<vmem>>, %arg2: memref<1x128xf32, #tpu.memory_space<vmem>>, %arg3: memref<1xf32, #tpu.memory_space<smem>>, %arg4: memref<1x128xf32, #tpu.memory_space<vmem>>, %arg5: memref<8x128xf32, #tpu.memory_space<vmem>>) attributes {dimension_semantics = [#tpu.dimension_semantics<parallel>], iteration_bounds = array<i64: 3>, scalar_prefetch = 0 : i64, scratch_operands = 0 : i64, tpu.core_type = #tpu.core_type<tc>, window_params = [{transform_indices = @transform_0, window_bounds = array<i64: 8, 128>}, {pipeline_mode = #tpu.pipeline_mode<synchronous>, transform_indices = @transform_1, window_bounds = array<i64: 1, 128>}, {transform_indices = @transform_2, window_bounds = array<i64: 1>}, {pipeline_mode = #tpu.pipeline_mode<synchronous>, transform_indices = @transform_3, window_bounds = array<i64: 1, 128>}, {transform_indices = @transform_4, window_bounds = array<i64: 8, 128>}]} {
    %c0 = arith.constant 0 : index
    %c0_0 = arith.constant 0 : index
    %0 = vector.load %arg1[%c0, %c0_0] : memref<8x128xf32, #tpu.memory_space<vmem>>, vector<8x128xf32>
    %c0_1 = arith.constant 0 : index
    %c0_2 = arith.constant 0 : index
    %1 = vector.load %arg2[%c0_1, %c0_2] : memref<1x128xf32, #tpu.memory_space<vmem>>, vector<1x128xf32>
    %2 = vector.broadcast %1 : vector<1x128xf32> to vector<8x128xf32>
    %3 = arith.mulf %0, %2 : vector<8x128xf32>
    %cst = arith.constant dense<0.000000e+00> : vector<8xf32>
    %4 = vector.multi_reduction <add>, %3, %cst [1] : vector<8x128xf32> to vector<8xf32>
    %5 = vector.shape_cast %4 : vector<8xf32> to vector<8x1xf32>
    %c0_3 = arith.constant 0 : index
    %6 = memref.load %arg3[%c0_3] : memref<1xf32, #tpu.memory_space<smem>>
    %7 = vector.broadcast %6 : f32 to vector<8x1xf32>
    %8 = arith.addf %5, %7 : vector<8x1xf32>
    %9 = math.tanh %8 : vector<8x1xf32>
    %c0_4 = arith.constant 0 : index
    %c0_5 = arith.constant 0 : index
    %10 = vector.load %arg4[%c0_4, %c0_5] : memref<1x128xf32, #tpu.memory_space<vmem>>, vector<1x128xf32>
    %11 = vector.broadcast %10 : vector<1x128xf32> to vector<8x128xf32>
    %12 = vector.broadcast %9 : vector<8x1xf32> to vector<8x128xf32>
    %13 = arith.mulf %11, %12 : vector<8x128xf32>
    %14 = arith.addf %0, %13 : vector<8x128xf32>
    %c0_6 = arith.constant 0 : index
    %c0_7 = arith.constant 0 : index
    %15 = vector.load %arg5[%c0_6, %c0_7] : memref<8x128xf32, #tpu.memory_space<vmem>>, vector<8x128xf32>
    tpu.vector_store %arg5[%c0_6, %c0_7], %14 {strides = array<i32>} : memref<8x128xf32, #tpu.memory_space<vmem>>, vector<8x128xf32>,
    return
  }
  func.func @transform_0(%arg0: i32) -> (i32, i32) {
    %c0_i32 = arith.constant 0 : i32
    %c0_i32_0 = arith.constant 0 : i32
    return %arg0, %c0_i32 : i32, i32
  }
  func.func @transform_1(%arg0: i32) -> (i32, i32) {
    %c0_i32 = arith.constant 0 : i32
    %c0_i32_0 = arith.constant 0 : i32
    %c0_i32_1 = arith.constant 0 : i32
    return %c0_i32, %c0_i32_0 : i32, i32
  }
  func.func @transform_2(%arg0: i32) -> i32 {
    %c0_i32 = arith.constant 0 : i32
    %c0_i32_0 = arith.constant 0 : i32
    return %c0_i32 : i32
  }
  func.func @transform_3(%arg0: i32) -> (i32, i32) {
    %c0_i32 = arith.constant 0 : i32
    %c0_i32_0 = arith.constant 0 : i32
    %c0_i32_1 = arith.constant 0 : i32
    return %c0_i32, %c0_i32_0 : i32, i32
  }
  func.func @transform_4(%arg0: i32) -> (i32, i32) {
    %c0_i32 = arith.constant 0 : i32
    %c0_i32_0 = arith.constant 0 : i32
    return %arg0, %c0_i32 : i32, i32
  }
}

</mosaic_0001>

<bundles_post_ra>
// kernel: tpu_custom_call.1
= control target key start
LH: loop header
LB: loop body
LE: loop exit
PB: predicated region body
PF: predicated region fallthrough
CT: control target
= control target key end

     0   :  { %s678_s0 = inlined_call_operand.hbm [shape: f32[24,128], index: 0, kind: input, shape index: {}]   ;;  %s679_s1 = inlined_call_operand.vmem [shape: f32[1,128], index: 1, kind: input, shape index: {}]   ;;  %s680_s2 = inlined_call_operand.<no memory space> [shape: f32[1], index: 2, kind: input, shape index: {}]   ;;  %s681_s3 = inlined_call_operand.vmem [shape: f32[1,128], index: 3, kind: input, shape index: {}]   ;;  %s682_s4 = inlined_call_operand.hbm [shape: f32[24,128], index: 4, kind: output, shape index: {}]  }
   0x1   :  { %9 = sst [smem:[#allocation2]] %s680_s2 }
   0x2   :  { %10 = vsyncpa [#allocation4], 0 }
   0x3   :  { %12 = vsyncpa [#allocation4 + $0x1], 0 }
   0x4   :  { %13 = vsyncpa [#allocation5], 0 }
   0x5   :  { %15 = vsyncpa [#allocation5 + $0x1], 0  ;;  %s513_s17 = smov 0   ;;  %s515_s18 = smov 0  }
   0x6   :  { %s517_s19 = smov 0   ;;  %s519_s20 = smov 0  }
   0x7 LB: > { %s534_s2 = sadd.s32 4294967295, %s481_s20   ;;  %s323_s21 = sadd.s32 4294967294, %s481_s20   ;;  %s481_s20 = sphi %s519_s20, %s696_s20   ;;  %s477_s19 = sphi %s517_s19, %s695_s19   ;;  %s473_s18 = sphi %s515_s18, %s694_s18   ;;  %s469_s17 = sphi %s513_s17, %s693_s17  }
   0x8   : > { %s538_s22 = sadd.s32 1, %s481_s20   ;;  %s28_s23 = sadd.s32 1, %s477_s19 }
   0x9   : > { %s25_s24 = ssub.s32 %s481_s20, %s538_s22  ;;  %p35_p0 = scmp.ne.s32.totalorder %s477_s19, %s473_s18 }
   0xa   : > { %p26_p1 = scmp.eq.s32.totalorder %s25_s24, 0  ;;  %p36_p2 = scmp.eq.s32.totalorder %s481_s20, 0 }
   0xb   : > { %p41_p3 = scmp.ne.s32.totalorder %s473_s18, %s469_s17  ;;  %p42_p4 = scmp.eq.s32.totalorder %s534_s2, 0 }
   0xc   : > { %s550_s25 = scalar_select %p26_p1, %s477_s19, %s28_s23  }
   0xd   : > { %p552_p5 = por %p36_p2, %p35_p0  ;;  %p556_p6 = por %p42_p4, %p41_p3 }
   0xe   : > { %p128_p7 = scmp.eq.s32.totalorder %s534_s2, 2  ;;  %p134_p8 = scmp.eq.s32.totalorder %s323_s21, 2 }
   0xf   : > { %p349_p9 = scmp.lt.s32.totalorder %s481_s20, 3  ;;  %s163_s30 = sand.u32 1, %s477_s19  }
  0x10   : > { %p562_p10 = por %p128_p7, %p35_p0  ;;  %p566_p11 = por %p134_p8, %p41_p3 }
  0x11   : > { %s327_s5 = sshll.u32 %s481_s20, 7  ;;  %s326_s6 = sshll.u32 %s163_s30, 3 }
  0x12   : > { %s686_s28 = scalar_select %p562_p10, 1, 0 }
  0x13   : > { %s687_s29 = scalar_select %p566_p11, 1, 0 }
  0x14   : > { %s575_s9 = scalar_lea.hbm %s678_s0, %s327_s5  ;;  %s167_s10 = scalar_lea.vmem [#allocation3], %s326_s6 }
  0x15   : > { %s174_s11 = sshll.u32 %s167_s10, 4  ;;  %p579_p12 = pnand %p349_p9, %p552_p5  ;;  %s583_s11 = int_to_ptr.vmem [resolvable:$true] %s174_s11 }
  0x16   : > { %s164_s13 = scalar_lea.sflag [#allocation4], %s163_s30  ;;  %s385_s14 = scalar_lea.hbm %s575_s9, 128 }
  0x17   : > { %p386_p1 = scmp.ne.s32.totalorder %s575_s9, %s385_s14  ;;  %p387_p2 = pneg %p579_p12 }
  0x18   : > { %s390_s21 = scalar_lea.hbm %s678_s0, 384  ;;  %p391_p5 = scmp.lt.u32.totalorder %s575_s9, %s678_s0 }
  0x19   : > { %p388_p3 = pnand %p387_p2, %p386_p1  ;;  %p392_p7 = scmp.lt.u32.totalorder %s390_s21, %s385_s14 }
  0x1a   : > { %p394_p9 = scmp.lt.u32.totalorder %s385_s14, %s575_s9 }
  0x1b   : > { %p389_p4 = pneg %p388_p3  ;;  %p393_p8 = por %p392_p7, %p391_p5 }
  0x1d   : > { %p395_p13 = por %p394_p9, %p393_p8 }
  0x1f   : > { %p396_p0 = pnand %p395_p13, %p389_p4 }
  0x21   : > { %399 = shalt.err (!%p396_p0)
}
  0x22   : > { %s400_s26 = scalar_lea.vmem %s583_s11, 128  ;;  %s483_s30 = smov [#allocation3]  }
  0x23   : > { %p401_p1 = scmp.ne.s32.totalorder %s583_s11, %s400_s26  ;;  %s405_s5 = sshll.u32 %s483_s30, 4  ;;  %s406_s5 = int_to_ptr.vmem [resolvable:$false] %s405_s5 }
  0x24   : > { %s407_s6 = scalar_lea.vmem %s406_s5, 256  ;;  %p408_p10 = scmp.lt.s32.totalorder %s583_s11, %s406_s5 }
  0x25   : > { %p403_p3 = pnand %p401_p1, %p387_p2  ;;  %p409_p5 = scmp.lt.s32.totalorder %s407_s6, %s400_s26 }
  0x27   : > { %p404_p11 = pneg %p403_p3  ;;  %p410_p7 = por %p409_p5, %p408_p10 }
  0x29   : > { %p411_p8 = pnand %p410_p7, %p404_p11 }
  0x2b   : > { %414 = shalt.err (!%p411_p8)
}
  0x2c   : > { %344 = dma.hbm_to_vmem [thread:$0]  (!%p579_p12), %s575_s9, 128, %s583_s11, %s164_s13  }
  0x2d   : > { %p689_p13 = scmp.lt.s32.totalorder %s481_s20, 4  ;;  %p690_p0 = scmp.ge.s32.totalorder %s481_s20, 1 }
  0x2f   : > { %p180_p2 = pnand %p690_p0, %p689_p13 }
  0x30   : > { %s617_s7 = sand.u32 (!%p180_p2), 1, %s473_s18  }
  0x31   : > { %183 = sbr.rel (%p180_p2) target bundleno = 234 (0xea), region = 36  ;;  %s329_s8 = sshll.u32 (!%p180_p2), %s617_s7, 3 }
  0x32   : > { %s186_s10 = scalar_lea.sflag (!%p180_p2), [#allocation4], %s617_s7  ;;  %s189_s14 = scalar_lea.vmem (!%p180_p2), [#allocation3], %s329_s8 }
  0x38   : > { %460 = dma.done.wait (%p556_p6), %s186_s10, 128  }
  0x39   : > { %462 = vsyncadd (%p556_p6), %s186_s10, 4294967168  ;;  %v214_v0 = vld [vmem:[%s189_s14] sm:$0xff]  ;;  %s225_s12 = sld [smem:[#allocation2]]  ;;  %s334_s27 = sshll.u32 %s534_s2, 7 }
  0x3a   : > { %v331_v1 = vld [vmem:[%s679_s1] ss:$0 sm:$0xff]  ;;  %s213_s16 = scalar_lea.vmem [#allocation6], %s329_s8  ;;  %s635_s26 = scalar_lea.hbm %s682_s4, %s334_s27 }
  0x3b   : > { %v222_v2 = vmul.f32 %v331_v1, %v214_v0  ;;  %v332_v6 = vld [vmem:[%s681_s3] ss:$0 sm:$0xff]  ;;  %s253_s21 = sshll.u32 %s213_s16, 4  ;;  %s240_s30 = scalar_lea.sflag [#allocation5], %s617_s7  ;;  %s637_s21 = int_to_ptr.vmem [resolvable:$true] %s253_s21 }
  0x3c   : > { %s415_s5 = scalar_lea.vmem %s637_s21, 128  ;;  %p691_p10 = scmp.ne.s32.totalorder %s686_s28, 0 }
  0x3d   : > { %223 = vadd.xlane.f32.xlu0 %v222_v2  ;;  %p416_p6 = scmp.ne.s32.totalorder %s637_s21, %s415_s5  ;;  %s484_s2 = smov [#allocation6]  }
  0x3e   : > { %s419_s6 = sshll.u32 %s484_s2, 4  ;;  %s420_s6 = int_to_ptr.vmem [resolvable:$false] %s419_s6 }
  0x3f   : > { %v226_v3 = vstv %s225_s12  ;;  %p417_p11 = pnand %p416_p6, %p691_p10  ;;  %s421_s8 = scalar_lea.vmem %s420_s6, 256 }
  0x40   : > { %p422_p4 = scmp.lt.s32.totalorder %s637_s21, %s420_s6  ;;  %p423_p9 = scmp.lt.s32.totalorder %s421_s8, %s415_s5 }
  0x41   : > { %p418_p12 = pneg %p417_p11 }
  0x42   : > { %p424_p1 = por %p423_p9, %p422_p4 }
  0x44   : > { %p425_p3 = pnand %p424_p1, %p418_p12 }
  0xca   : > { %v224_v4 = vpop.xlane.xlu0 %223 }
  0xcb   : > { %v227_v5 = vadd.f32 %v226_v3, %v224_v4 }
  0xcd   : > { %383 = vtanh.f32 %v227_v5 }
  0xd7   : > { %v384_v7 = vpop.eup %383 }
  0xd8   : > { %v236_v8 = vmul.f32 %v384_v7, %v332_v6 }
  0xda   : > { %v237_v9 = vadd.f32 %v236_v8, %v214_v0 }
  0xdc   : > { %238 = vst [vmem:[%s213_s16] sm:$0xff] %v237_v9 }
  0xdd   : > { %428 = shalt.err (!%p425_p3)
}
  0xde   : > { %s429_s7 = scalar_lea.hbm %s635_s26, 128  ;;  %s433_s9 = scalar_lea.hbm %s682_s4, 384 }
  0xdf   : > { %p430_p5 = scmp.ne.s32.totalorder %s635_s26, %s429_s7  ;;  %p434_p13 = scmp.lt.u32.totalorder %s635_s26, %s682_s4 }
  0xe0   : > { %p435_p0 = scmp.lt.u32.totalorder %s433_s9, %s429_s7  ;;  %p437_p6 = scmp.lt.u32.totalorder %s429_s7, %s635_s26 }
  0xe1   : > { %p431_p7 = pnand %p430_p5, %p691_p10 }
  0xe2   : > { %p436_p2 = por %p435_p0, %p434_p13 }
  0xe3   : > { %p432_p8 = pneg %p431_p7 }
  0xe4   : > { %p438_p11 = por %p437_p6, %p436_p2 }
  0xe6   : > { %p439_p12 = pnand %p438_p11, %p432_p8 }
  0xe8   : > { %442 = shalt.err (!%p439_p12)
}
  0xe9   : > { %339 = dma.vmem_to_hbm [thread:$0]  (%p691_p10), %s637_s21, 128, %s635_s26, %s240_s30  }
  0xea PF: > { %p350_p4 = scmp.ge.s32.totalorder %s481_s20, 2  ;;  %s265_s13 = sand.u32 1, %s469_s17  }
  0xeb   : > { %p692_p9 = scmp.ne.s32.totalorder %s687_s29, 0  ;;  %s266_s15 = scalar_lea.sflag [#allocation5], %s265_s13 }
  0xed   : > { %p346_p1 = pnand %p350_p4, %p692_p9 }
  0xef   : > { %464 = dma.done.wait (!%p346_p1), %s266_s15, 128  }
  0xf0   : > { %466 = vsyncadd (!%p346_p1), %s266_s15, 4294967168  ;;  %p18_p3 = scmp.ge.s32.totalorder %s538_s22, 5   ;;  %s693_s17 = smov %s473_s18 }
  0xf1   : > { %s694_s18 = smov %s477_s19  ;;  %s695_s19 = smov %s550_s25 }
  0xf2   : > { %s696_s20 = smov %s538_s22  ;;  %20 = sbr.rel (!%p18_p3) target bundleno = 7 (0x7), region = 81 }
  0xf9   :  { %271 = vsyncpa [#allocation4], 1 }
  0xfa   :  { %273 = vsyncpa [#allocation4 + $0x1], 1 }
  0xfb   :  { %274 = vsyncpa [#allocation5], 1 }
  0xfc   :  { %276 = vsyncpa [#allocation5 + $0x1], 1 }

</bundles_post_ra>
